<compile_context>
chip_gen: v7x
topology: tpu7x:2x2x1
jax: 0.10.0
libtpu: 0.0.40
codegen_flags: <defaults>
</compile_context>

<pallas_src>
import jax
import jax.numpy as jnp
from jax.experimental import pallas as pl
from jax.experimental.pallas import tpu as pltpu


def _puremf_fused_kernel(u_idx_ref, i_idx_ref, u_tbl_ref, i_tbl_ref, o_ref):
    # u_idx_ref, i_idx_ref: (1, tb) int32 index blocks (batch on the lane axis)
    # u_tbl_ref:            (D, Nu) float32 user table, VMEM-resident
    # i_tbl_ref:            (D, Ni) float32 item table, VMEM-resident
    # o_ref:                (1, tb) float32 lane-dense output block
    nu = u_tbl_ref.shape[1]
    ni = i_tbl_ref.shape[1]
    tb = u_idx_ref.shape[1]

    u_idx = u_idx_ref[...]                                   # (1, tb) int32
    i_idx = i_idx_ref[...]                                   # (1, tb) int32

    # One-hot dispatch matrices: column j selects table row idx[j].
    # Built on the VPU; the actual "gather" is an MXU matmul.
    u_oh = jnp.where(
        jax.lax.broadcasted_iota(jnp.int32, (nu, tb), 0) == u_idx, 1.0, 0.0
    ).astype(jnp.float32)                                    # (Nu, tb)
    i_oh = jnp.where(
        jax.lax.broadcasted_iota(jnp.int32, (ni, tb), 0) == i_idx, 1.0, 0.0
    ).astype(jnp.float32)                                    # (Ni, tb)

    u_emb = jnp.dot(u_tbl_ref[...], u_oh,
                    preferred_element_type=jnp.float32)      # (D, tb)
    i_emb = jnp.dot(i_tbl_ref[...], i_oh,
                    preferred_element_type=jnp.float32)      # (D, tb)

    s = jnp.sum(u_emb * i_emb, axis=0, keepdims=True)        # (1, tb) sublane reduce
    o_ref[...] = jax.nn.sigmoid(s)                           # EUP exp + reciprocal


def _round_up(x: int, m: int) -> int:
    return ((x + m - 1) // m) * m


def _vmem_working_budget() -> int:
    """Bytes of VMEM the kernel working set may occupy (generation aware)."""
    try:
        cap = pltpu.get_tpu_info().vmem_capacity_bytes
    except Exception:
        cap = 64 * 1024 * 1024  # conservative fallback (v7x-sized)
    # Stay well inside the 32 MiB scoped limit requested below and v7x's
    # 64 MiB physical VMEM: cap//4 = 16 MiB on v7x, 32 MiB on v5e/v6e.
    return min(cap // 4, 16 * 1024 * 1024)


def _choose_tb(batch: int, d: int, nu: int, ni: int) -> int:
    """Batch-tile size: lane-dense, fits the VMEM budget, keeps >=2 grid steps."""
    budget = _vmem_working_budget()
    table_bytes = 4 * d * (nu + ni)                 # resident tables
    # Per output column: two one-hot columns (Nu+Ni f32), gathered embedding
    # columns + product (3*D f32), double-buffered index blocks + output.
    per_col = 4 * (nu + ni) + 4 * 3 * d + 24
    cap = max(128, ((budget - table_bytes) // per_col) // 128 * 128)
    tb = min(32 * 1024, cap)
    b128 = _round_up(batch, 128)
    tb = min(tb, b128)
    # Keep at least 2 grid steps when the batch allows it (v7x megacore).
    if b128 >= 256 and tb > b128 // 2:
        tb = max(128, (b128 // 2) // 128 * 128)
    return tb


def puremf_forward(user_table_t: jax.Array, item_table_t: jax.Array,
                   users: jax.Array, items: jax.Array,
                   *, tb: int | None = None) -> jax.Array:
    """sigmoid(<user_emb[users], item_emb[items]>), gather fused in-kernel.

    user_table_t: (D, num_users) float32 (transposed; VMEM-resident in-kernel)
    item_table_t: (D, num_items) float32
    users, items: (B,) integer ids
    Returns:      (B,) float32
    """
    d, nu = user_table_t.shape
    d2, ni = item_table_t.shape
    assert d == d2, "latent dims of the two tables must match"
    assert users.shape == items.shape and users.ndim == 1
    b = users.shape[0]

    assert 4 * d * (nu + ni) <= _vmem_working_budget(), (
        "embedding tables exceed the VMEM budget; use the HBM-resident "
        "manual-DMA gather path (see TODO(synk) at top of file)")

    if tb is None:
        tb = _choose_tb(b, d, nu, ni)
    assert tb % 128 == 0, "tb must be a multiple of 128 for lane-dense blocks"

    bp = _round_up(b, tb)
    # Only the cheap int32 index vectors are padded (padded columns gather
    # row 0; their sigmoid values are sliced off below).
    users_p = jnp.pad(users.astype(jnp.int32), (0, bp - b)).reshape(1, bp)
    items_p = jnp.pad(items.astype(jnp.int32), (0, bp - b)).reshape(1, bp)

    out = pl.pallas_call(
        _puremf_fused_kernel,
        out_shape=jax.ShapeDtypeStruct((1, bp), jnp.float32),
        grid_spec=pltpu.PrefetchScalarGridSpec(
            num_scalar_prefetch=0,
            grid=(bp // tb,),
            in_specs=[
                pl.BlockSpec((1, tb), lambda bi: (0, bi)),   # user ids
                pl.BlockSpec((1, tb), lambda bi: (0, bi)),   # item ids
                pl.BlockSpec((d, nu), lambda bi: (0, 0)),    # user table (resident)
                pl.BlockSpec((d, ni), lambda bi: (0, 0)),    # item table (resident)
            ],
            out_specs=pl.BlockSpec((1, tb), lambda bi: (0, bi)),
        ),
        compiler_params=pltpu.CompilerParams(
            dimension_semantics=("parallel",),
            vmem_limit_bytes=32 * 1024 * 1024,
        ),
    )(users_p, items_p, user_table_t, item_table_t)
    return out[0, :b]


class PureMFPallas:
    """JAX/Pallas port of PureMF (forward path only)."""

    def __init__(self, num_users: int, num_items: int, latent_dim: int,
                 key: jax.Array):
        ku, ki = jax.random.split(key)
        # "using Normal distribution N(0,1) initialization for PureMF".
        # Tables stored transposed (D, num_rows): the fused kernel serves them
        # from VMEM, so the layout only needs to suit the in-kernel lane-dense
        # (D, tb) compute, not a host-side row gather.
        self.embedding_user_t = jax.random.normal(
            ku, (latent_dim, num_users), dtype=jnp.float32)
        self.embedding_item_t = jax.random.normal(
            ki, (latent_dim, num_items), dtype=jnp.float32)

    def forward(self, users: jax.Array, items: jax.Array) -> jax.Array:
        return puremf_forward(self.embedding_user_t, self.embedding_item_t,
                              users, items)


if __name__ == "__main__":
    key = jax.random.PRNGKey(0)
    k_model, k_users, k_items, k_u2, k_i2 = jax.random.split(key, 5)

    num_users, num_items, latent_dim = 64, 96, 32
    batch = 16

    model = PureMFPallas(num_users, num_items, latent_dim, k_model)

    # --- small-batch check (single tile, indices padded 16 -> 128) ----------
    users = jax.random.randint(k_users, (batch,), 0, num_users, dtype=jnp.int32)
    items = jax.random.randint(k_items, (batch,), 0, num_items, dtype=jnp.int32)

    scores = jax.block_until_ready(model.forward(users, items))

    ue_t = jnp.take(model.embedding_user_t, users, axis=1)   # reference only
    ie_t = jnp.take(model.embedding_item_t, items, axis=1)
    ref = jax.nn.sigmoid(jnp.sum(ue_t * ie_t, axis=0))
    assert scores.shape == (batch,)
    assert jnp.allclose(scores, ref, atol=1e-4, rtol=1e-4)

    # --- multi-tile + ragged-batch check (grid > 1, index-padding path) -----
    batch2 = 300
    users2 = jax.random.randint(k_u2, (batch2,), 0, num_users, dtype=jnp.int32)
    items2 = jax.random.randint(k_i2, (batch2,), 0, num_items, dtype=jnp.int32)
    scores2 = jax.block_until_ready(
        puremf_forward(model.embedding_user_t, model.embedding_item_t,
                       users2, items2, tb=128))
    ue2_t = jnp.take(model.embedding_user_t, users2, axis=1)
    ie2_t = jnp.take(model.embedding_item_t, items2, axis=1)
    ref2 = jax.nn.sigmoid(jnp.sum(ue2_t * ie2_t, axis=0))
    assert scores2.shape == (batch2,)
    assert jnp.allclose(scores2, ref2, atol=1e-4, rtol=1e-4)

    print("KERNEL_OK")
</pallas_src>

<mosaic_0001>
module attributes {stable_mosaic.version = 11 : i64} {
  func.func @_puremf_fused_kernel(%arg0: i32, %arg1: memref<1x128xi32, #tpu.memory_space<vmem>>, %arg2: memref<1x128xi32, #tpu.memory_space<vmem>>, %arg3: memref<32x64xf32, #tpu.memory_space<vmem>>, %arg4: memref<32x96xf32, #tpu.memory_space<vmem>>, %arg5: memref<1x128xf32, #tpu.memory_space<vmem>>) attributes {dimension_semantics = [#tpu.dimension_semantics<parallel>], iteration_bounds = array<i64: 1>, scalar_prefetch = 0 : i64, scratch_operands = 0 : i64, tpu.core_type = #tpu.core_type<tc>, window_params = [{transform_indices = @transform_0, window_bounds = array<i64: 1, 128>}, {transform_indices = @transform_1, window_bounds = array<i64: 1, 128>}, {pipeline_mode = #tpu.pipeline_mode<synchronous>, transform_indices = @transform_2, window_bounds = array<i64: 32, 64>}, {pipeline_mode = #tpu.pipeline_mode<synchronous>, transform_indices = @transform_3, window_bounds = array<i64: 32, 96>}, {transform_indices = @transform_4, window_bounds = array<i64: 1, 128>}]} {
    %c0 = arith.constant 0 : index
    %c0_0 = arith.constant 0 : index
    %0 = vector.load %arg1[%c0, %c0_0] : memref<1x128xi32, #tpu.memory_space<vmem>>, vector<1x128xi32>
    %c0_1 = arith.constant 0 : index
    %c0_2 = arith.constant 0 : index
    %1 = vector.load %arg2[%c0_1, %c0_2] : memref<1x128xi32, #tpu.memory_space<vmem>>, vector<1x128xi32>
    %2 = tpu.iota {dimensions = array<i32: 0>} : vector<64x128xi32>
    %3 = vector.broadcast %0 : vector<1x128xi32> to vector<64x128xi32>
    %4 = arith.cmpi eq, %2, %3 : vector<64x128xi32>
    %cst = arith.constant 1.000000e+00 : f32
    %cst_3 = arith.constant 0.000000e+00 : f32
    %5 = vector.broadcast %cst : f32 to vector<64x128xf32>
    %6 = vector.broadcast %cst_3 : f32 to vector<64x128xf32>
    %7 = arith.select %4, %5, %6 : vector<64x128xi1>, vector<64x128xf32>
    %8 = tpu.iota {dimensions = array<i32: 0>} : vector<96x128xi32>
    %9 = vector.broadcast %1 : vector<1x128xi32> to vector<96x128xi32>
    %10 = arith.cmpi eq, %8, %9 : vector<96x128xi32>
    %cst_4 = arith.constant 1.000000e+00 : f32
    %cst_5 = arith.constant 0.000000e+00 : f32
    %11 = vector.broadcast %cst_4 : f32 to vector<96x128xf32>
    %12 = vector.broadcast %cst_5 : f32 to vector<96x128xf32>
    %13 = arith.select %10, %11, %12 : vector<96x128xi1>, vector<96x128xf32>
    %c0_6 = arith.constant 0 : index
    %c0_7 = arith.constant 0 : index
    %14 = vector.load %arg3[%c0_6, %c0_7] : memref<32x64xf32, #tpu.memory_space<vmem>>, vector<32x64xf32>
    %cst_8 = arith.constant dense<0.000000e+00> : vector<32x128xf32>
    %15 = tpu.matmul %14, %7, %cst_8 {dimension_numbers = #tpu.dot_dimension_numbers<[1], [0], [0], [1], [0, 0, 1, 1], [], []>} : vector<32x64xf32>, vector<64x128xf32>, vector<32x128xf32> -> vector<32x128xf32>
    %c0_9 = arith.constant 0 : index
    %c0_10 = arith.constant 0 : index
    %16 = vector.load %arg4[%c0_9, %c0_10] : memref<32x96xf32, #tpu.memory_space<vmem>>, vector<32x96xf32>
    %cst_11 = arith.constant dense<0.000000e+00> : vector<32x128xf32>
    %17 = tpu.matmul %16, %13, %cst_11 {dimension_numbers = #tpu.dot_dimension_numbers<[1], [0], [0], [1], [0, 0, 1, 1], [], []>} : vector<32x96xf32>, vector<96x128xf32>, vector<32x128xf32> -> vector<32x128xf32>
    %18 = arith.mulf %15, %17 : vector<32x128xf32>
    %cst_12 = arith.constant dense<0.000000e+00> : vector<128xf32>
    %19 = vector.multi_reduction <add>, %18, %cst_12 [0] : vector<32x128xf32> to vector<128xf32>
    %20 = vector.shape_cast %19 : vector<128xf32> to vector<1x128xf32>
    %21 = arith.negf %20 : vector<1x128xf32>
    %22 = math.exp %21 : vector<1x128xf32>
    %cst_13 = arith.constant 1.000000e+00 : f32
    %23 = vector.broadcast %cst_13 : f32 to vector<1x128xf32>
    %24 = arith.addf %23, %22 : vector<1x128xf32>
    %25 = arith.divf %23, %24 : vector<1x128xf32>
    %c0_14 = arith.constant 0 : index
    %c0_15 = arith.constant 0 : index
    %26 = vector.load %arg5[%c0_14, %c0_15] : memref<1x128xf32, #tpu.memory_space<vmem>>, vector<1x128xf32>
    tpu.vector_store %arg5[%c0_14, %c0_15], %25 {strides = array<i32>} : memref<1x128xf32, #tpu.memory_space<vmem>>, vector<1x128xf32>,
    return
  }
  func.func @transform_0(%arg0: i32) -> (i32, i32) {
    %c0_i32 = arith.constant 0 : i32
    %c0_i32_0 = arith.constant 0 : i32
    return %c0_i32, %arg0 : i32, i32
  }
  func.func @transform_1(%arg0: i32) -> (i32, i32) {
    %c0_i32 = arith.constant 0 : i32
    %c0_i32_0 = arith.constant 0 : i32
    return %c0_i32, %arg0 : i32, i32
  }
  func.func @transform_2(%arg0: i32) -> (i32, i32) {
    %c0_i32 = arith.constant 0 : i32
    %c0_i32_0 = arith.constant 0 : i32
    %c0_i32_1 = arith.constant 0 : i32
    return %c0_i32, %c0_i32_0 : i32, i32
  }
  func.func @transform_3(%arg0: i32) -> (i32, i32) {
    %c0_i32 = arith.constant 0 : i32
    %c0_i32_0 = arith.constant 0 : i32
    %c0_i32_1 = arith.constant 0 : i32
    return %c0_i32, %c0_i32_0 : i32, i32
  }
  func.func @transform_4(%arg0: i32) -> (i32, i32) {
    %c0_i32 = arith.constant 0 : i32
    %c0_i32_0 = arith.constant 0 : i32
    return %c0_i32, %arg0 : i32, i32
  }
}

</mosaic_0001>

<bundles_post_ra>
// kernel: tpu_custom_call.1
= control target key start
LH: loop header
LB: loop body
LE: loop exit
PB: predicated region body
PF: predicated region fallthrough
CT: control target
= control target key end

     0   :  { %9 = vsyncpa [#allocation3], 0  ;;  %s729_s0 = inlined_call_operand.hbm [shape: s32[1,128], index: 0, kind: input, shape index: {}]   ;;  %s730_s1 = inlined_call_operand.vmem [shape: s32[1,128], index: 1, kind: input, shape index: {}]   ;;  %s731_s2 = inlined_call_operand.hbm [shape: f32[32,64], index: 2, kind: input, shape index: {}]   ;;  %s732_s3 = inlined_call_operand.hbm [shape: f32[32,96], index: 3, kind: input, shape index: {}]   ;;  %s733_s4 = inlined_call_operand.hbm [shape: f32[1,128], index: 4, kind: output, shape index: {}]  }
   0x1   :  { %10 = vsyncpa [#allocation6], 0 }
   0x2   :  { %11 = vsyncpa [#allocation4], 0  ;;  %s616_s15 = smov [#allocation5]   ;;  %s522_s19 = scalar_lea.hbm %s731_s2, 512 }
   0x3   :  { %s29_s16 = sshll.u32 %s616_s15, 4  ;;  %p523_p0 = scmp.ne.s32.totalorder %s731_s2, %s522_s19  ;;  %s30_s16 = int_to_ptr.vmem [resolvable:$true] %s29_s16 }
   0x4   :  { %p526_p1 = scmp.lt.u32.totalorder %s522_s19, %s731_s2 }
   0x6   :  { %p528_p2 = pnand %p526_p1, %p523_p0 }
   0x8   :  { %531 = shalt.err (!%p528_p2)
}
   0x9   :  { %s532_s24 = scalar_lea.vmem %s30_s16, 512  ;;  %p537_p4 = scmp.lt.s32.totalorder %s30_s16, %s30_s16 }
   0xa   :  { %p533_p3 = scmp.ne.s32.totalorder %s30_s16, %s532_s24  ;;  %p538_p5 = scmp.lt.s32.totalorder %s532_s24, %s532_s24 }
   0xc   :  { %p539_p6 = por %p538_p5, %p537_p4 }
   0xe   :  { %p540_p7 = pnand %p539_p6, %p533_p3 }
  0x10   :  { %543 = shalt.err (!%p540_p7)
}
  0x11   :  { %s617_s25 = smov 128   ;;  %s618_s26 = smov 8  }
  0x12   :  { %35 = dma.hbm_to_vmem [thread:$0]  %s731_s2, 512, %s30_s16, [#allocation6], %s617_s25, %s617_s25, %s618_s26  }
  0x13   :  { %s619_s29 = smov [#allocation2]   ;;  %s620_s5 = smov [#allocation7]  }
  0x14   :  { %s18_s30 = sshll.u32 %s619_s29, 4  ;;  %s41_s6 = sshll.u32 %s620_s5, 4  ;;  %s19_s30 = int_to_ptr.vmem [resolvable:$true] %s18_s30  ;;  %s42_s6 = int_to_ptr.vmem [resolvable:$true] %s41_s6 }
  0x15   :  { %s544_s9 = scalar_lea.hbm %s729_s0, 16 }
  0x16   :  { %p545_p8 = scmp.ne.s32.totalorder %s729_s0, %s544_s9  ;;  %p548_p9 = scmp.lt.u32.totalorder %s544_s9, %s729_s0 }
  0x18   :  { %p550_p10 = pnand %p548_p9, %p545_p8 }
  0x1a   :  { %553 = shalt.err (!%p550_p10)
}
  0x1b   :  { %s554_s2 = scalar_lea.vmem %s19_s30, 16  ;;  %s558_s14 = scalar_lea.vmem %s19_s30, 32 }
  0x1c   :  { %p555_p11 = scmp.ne.s32.totalorder %s19_s30, %s554_s2  ;;  %p559_p12 = scmp.lt.s32.totalorder %s19_s30, %s19_s30 }
  0x1d   :  { %p560_p13 = scmp.lt.s32.totalorder %s558_s14, %s554_s2 }
  0x1f   :  { %p561_p0 = por %p560_p13, %p559_p12 }
  0x21   :  { %p562_p1 = pnand %p561_p0, %p555_p11 }
  0x23   :  { %565 = shalt.err (!%p562_p1)
}
  0x24   :  { %21 = dma.hbm_to_vmem [thread:$0]  %s729_s0, 16, %s19_s30, [#allocation3]  }
  0x25   :  { %s566_s19 = scalar_lea.hbm %s732_s3, 512 }
  0x26   :  { %p567_p2 = scmp.ne.s32.totalorder %s732_s3, %s566_s19  ;;  %p570_p3 = scmp.lt.u32.totalorder %s566_s19, %s732_s3 }
  0x28   :  { %p572_p4 = pnand %p570_p3, %p567_p2 }
  0x2a   :  { %575 = shalt.err (!%p572_p4)
}
  0x2b   :  { %s576_s24 = scalar_lea.vmem %s42_s6, 512  ;;  %p581_p6 = scmp.lt.s32.totalorder %s42_s6, %s42_s6 }
  0x2c   :  { %p577_p5 = scmp.ne.s32.totalorder %s42_s6, %s576_s24  ;;  %p582_p7 = scmp.lt.s32.totalorder %s576_s24, %s576_s24 }
  0x2e   :  { %p583_p8 = por %p582_p7, %p581_p6 }
  0x30   :  { %p584_p9 = pnand %p583_p8, %p577_p5 }
  0x32   :  { %587 = shalt.err (!%p584_p9)
}
  0x33   :  { %47 = dma.hbm_to_vmem [thread:$0]  %s732_s3, 512, %s42_s6, [#allocation6], %s617_s25, %s617_s25, %s618_s26  }
  0x34   :  { %610 = dma.done.wait [#allocation3], 16  }
  0x35   :  { %611 = vsyncadd [#allocation3], 4294967280 }
  0x36   :  { %612 = dma.done.wait [#allocation6], 1024  }
  0x37   :  { %613 = vsyncadd [#allocation6], 4294966272  ;;  %v59_v0 = vlaneseq  ;;  %vm124_vm0 = vcmask 523264   ;;  %vm734_vm1 = vcmask 785408   ;;  %v361_v7 = vld [vmem:[%s730_s1] ss:$0 sm:$0xff] }
  0x38   :  { %v360_v8 = vld [vmem:[#allocation2] ss:$0 sm:$0xff]  ;;  %v120_v9 = vld [vmem:[#allocation5] sm:$0xff]  ;;  %v621_v11 = vmov 1.0|1.0   ;;  %v121_v20 = vld [vmem:[#allocation5 + $0x8] sm:$0xff] }
  0x39   :  { %v60_v1 = vshrl.u32 %v59_v0, 7  ;;  %435 = vmatprep.mubr.msk.f32.mxu0 %vm124_vm0, %v120_v9  ;;  %v222_v10 = vld [vmem:[#allocation7] sm:$0xff]  ;;  %v122_v21 = vld [vmem:[#allocation5 + $0x10] sm:$0xff]  ;;  %v123_v22 = vld [vmem:[#allocation5 + $0x18] sm:$0xff]  ;;  %s622_s1 = smov [#allocation8]  }
  0x3a   :  { %465 = vmatprep.mubr.msk.f32.mxu1 %vm734_vm1, %v222_v10  ;;  %v223_v23 = vld [vmem:[#allocation7 + $0x8] sm:$0xff]  ;;  %v224_v24 = vld [vmem:[#allocation7 + $0x10] sm:$0xff]  ;;  %v225_v25 = vld [vmem:[#allocation7 + $0x18] sm:$0xff]  ;;  %s350_s3 = sshll.u32 %s622_s1, 4  ;;  %s351_s3 = int_to_ptr.vmem [resolvable:$true] %s350_s3 }
  0x3b   :  { %v61_v2 = vadd.s32 8, %v60_v1  ;;  %v62_v3 = vadd.s32 16, %v60_v1  ;;  %v63_v4 = vadd.s32 24, %v60_v1  ;;  %v64_v5 = vadd.s32 32, %v60_v1  ;;  %s588_s25 = scalar_lea.vmem %s351_s3, 16  ;;  %s592_s26 = scalar_lea.vmem %s351_s3, 32 }
  0x3c   :  { %v65_v6 = vadd.s32 40, %v60_v1  ;;  %vm96_vm2 = vcmp.eq.s32.totalorder %v60_v1, %v361_v7  ;;  %vm72_vm7 = vcmp.eq.s32.totalorder %v60_v1, %v360_v8  ;;  %v66_v13 = vadd.s32 48, %v60_v1  ;;  %p589_p10 = scmp.ne.s32.totalorder %s351_s3, %s588_s25  ;;  %p593_p11 = scmp.lt.s32.totalorder %s351_s3, %s351_s3 }
  0x3d   :  { %vm97_vm3 = vcmp.eq.s32.totalorder %v61_v2, %v361_v7  ;;  %vm98_vm4 = vcmp.eq.s32.totalorder %v62_v3, %v361_v7  ;;  %vm99_vm5 = vcmp.eq.s32.totalorder %v63_v4, %v361_v7  ;;  %vm73_vm8 = vcmp.eq.s32.totalorder %v61_v2, %v360_v8  ;;  %p594_p12 = scmp.lt.s32.totalorder %s592_s26, %s588_s25 }
  0x3e   :  { %vm487_vm6 = vmpackc.low %vm97_vm3, %vm96_vm2  ;;  %vm100_vm9 = vcmp.eq.s32.totalorder %v64_v5, %v361_v7  ;;  %vm101_vm10 = vcmp.eq.s32.totalorder %v65_v6, %v361_v7  ;;  %vm74_vm12 = vcmp.eq.s32.totalorder %v62_v3, %v360_v8  ;;  %vm75_vm13 = vcmp.eq.s32.totalorder %v63_v4, %v360_v8 }
  0x3f   :  { %488 = vmatprep.subr.msk.bf16.mxu1 %vm487_vm6, %v621_v11  ;;  %vm695_vm11 = vmpackc.low %vm99_vm5, %vm98_vm4  ;;  %v67_v14 = vadd.s32 56, %v60_v1  ;;  %vm76_vm2 = vcmp.eq.s32.totalorder %v64_v5, %v360_v8  ;;  %vm77_vm3 = vcmp.eq.s32.totalorder %v65_v6, %v360_v8  ;;  %vm102_vm5 = vcmp.eq.s32.totalorder %v66_v13, %v361_v7  ;;  %p595_p13 = por %p594_p12, %p593_p11 }
  0x40   :  { %490 = vmatpush3.bf16.msk.msra.mxu1 %vm487_vm6, %v621_v11  ;;  %vm471_vm14 = vmpackc.low %vm73_vm8, %vm72_vm7  ;;  %v88_v16 = vadd.s32 64, %v60_v1  ;;  %v89_v17 = vadd.s32 72, %v60_v1  ;;  %vm78_vm7 = vcmp.eq.s32.totalorder %v66_v13, %v360_v8  ;;  %v90_v18 = vadd.s32 80, %v60_v1 }
  0x41   :  { %492 = vmatprep.subr.msk.bf16.mxu1 %vm695_vm11, %v621_v11  ;;  %472 = vmatprep.subr.msk.bf16.mxu0 %vm471_vm14, %v621_v11  ;;  %vm701_vm15 = vmpackc.low %vm101_vm10, %vm100_vm9  ;;  %vm103_vm1 = vcmp.eq.s32.totalorder %v67_v14, %v361_v7  ;;  %vm79_vm8 = vcmp.eq.s32.totalorder %v67_v14, %v360_v8  ;;  %v91_v19 = vadd.s32 88, %v60_v1  ;;  %p596_p0 = pnand %p595_p13, %p589_p10 }
  0x42   :  { %474 = vmatpush3.bf16.msk.msra.mxu0 %vm471_vm14, %v621_v11  ;;  %vm475_vm4 = vmpackc.low %vm75_vm13, %vm74_vm12  ;;  %vm104_vm10 = vcmp.eq.s32.totalorder %v88_v16, %v361_v7  ;;  %vm105_vm14 = vcmp.eq.s32.totalorder %v89_v17, %v361_v7  ;;  %vm106_vm13 = vcmp.eq.s32.totalorder %v90_v18, %v361_v7 }
  0x43   :  { %476 = vmatprep.subr.msk.bf16.mxu0 %vm475_vm4, %v621_v11  ;;  %vm479_vm6 = vmpackc.low %vm77_vm3, %vm76_vm2  ;;  %vm107_vm2 = vcmp.eq.s32.totalorder %v91_v19, %v361_v7 }
  0x44   :  { %494 = vmatpush3.bf16.msk.msra.mxu1 %vm695_vm11, %v621_v11  ;;  %vm499_vm9 = vmpackc.low %vm103_vm1, %vm102_vm5  ;;  %vm739_vm1 = vcmask 785408  }
  0x45   :  { %496 = vmatprep.subr.msk.bf16.mxu1 %vm701_vm15, %v621_v11  ;;  %vm483_vm12 = vmpackc.low %vm79_vm8, %vm78_vm7 }
  0x46   :  { %478 = vmatpush3.bf16.msk.msra.mxu0 %vm475_vm4, %v621_v11  ;;  %vm503_vm11 = vmpackc.low %vm105_vm14, %vm104_vm10 }
  0x47   :  { %480 = vmatprep.subr.msk.bf16.mxu0 %vm479_vm6, %v621_v11  ;;  %vm507_vm3 = vmpackc.low %vm107_vm2, %vm106_vm13 }
  0x48   :  { %498 = vmatpush3.bf16.msk.msra.mxu1 %vm701_vm15, %v621_v11  ;;  %vm740_vm15 = vmmov %vm739_vm1 }
  0x49   :  { %500 = vmatprep.subr.msk.bf16.mxu1 %vm499_vm9, %v621_v11  ;;  %vm741_vm4 = vmmov %vm739_vm1 }
  0x4a   :  { %482 = vmatpush3.bf16.msk.msra.mxu0 %vm479_vm6, %v621_v11 }
  0x4b   :  { %484 = vmatprep.subr.msk.bf16.mxu0 %vm483_vm12, %v621_v11 }
  0x4c   :  { %502 = vmatpush3.bf16.msk.msra.mxu1 %vm499_vm9, %v621_v11 }
  0x4d   :  { %504 = vmatprep.subr.msk.bf16.mxu1 %vm503_vm11, %v621_v11 }
  0x4e   :  { %486 = vmatpush3.bf16.msk.msra.mxu0 %vm483_vm12, %v621_v11 }
  0x50   :  { %506 = vmatpush3.bf16.msk.msra.mxu1 %vm503_vm11, %v621_v11 }
  0x51   :  { %508 = vmatprep.subr.msk.bf16.mxu1 %vm507_vm3, %v621_v11  ;;  %436 = vmatmul.mubr.msk.f32.vlgmr.msra.gmra.mrb[0].mxu0 %vm124_vm0, %v121_v20 }
  0x52   :  { %438 = vmatprep.mubr.msk.f32.mxu0 %vm124_vm0, %v122_v21 }
  0x54   :  { %510 = vmatpush3.bf16.msk.msra.mxu1 %vm507_vm3, %v621_v11 }
  0x55   :  { %439 = vmatmul.mubr.msk.f32.gmra.mrb[2].mxu0 %vm124_vm0, %v123_v22 }
  0x57   :  { %466 = vmatmul.mubr.msk.f32.vlgmr.msra.gmra.mrb[0].mxu1 %vm739_vm1, %v223_v23 }
  0x58   :  { %468 = vmatprep.mubr.msk.f32.mxu1 %vm740_vm15, %v224_v24 }
  0x5b   :  { %469 = vmatmul.mubr.msk.f32.gmra.mrb[2].mxu1 %vm741_vm4, %v225_v25 }
 0x124   :  { %v437_v26 = vpop.f32.mrb[0].mxu0 }
 0x125   :  { %v203_v27 = vpop.f32.mrb[1].mxu0 }
 0x128   :  { %v440_v28 = vpop.f32.mrb[2].mxu0 }
 0x129   :  { %v213_v29 = vpop.f32.mrb[3].mxu0 }
 0x12a   :  { %v467_v30 = vpop.f32.mrb[0].mxu1 }
 0x12b   :  { %v325_v31 = vmul.f32 %v467_v30, %v437_v26  ;;  %v305_v32 = vpop.f32.mrb[1].mxu1 }
 0x12c   :  { %v324_v33 = vmul.f32 %v305_v32, %v203_v27 }
 0x12e   :  { %v328_v34 = vadd.f32 %v325_v31, %v324_v33  ;;  %v470_v35 = vpop.f32.mrb[2].mxu1 }
 0x12f   :  { %v327_v36 = vmul.f32 %v470_v35, %v440_v28  ;;  %v315_v37 = vpop.f32.mrb[3].mxu1 }
 0x130   :  { %v326_v38 = vmul.f32 %v315_v37, %v213_v29 }
 0x132   :  { %v329_v39 = vadd.f32 %v328_v34, %v326_v38 }
 0x134   :  { %v330_v40 = vadd.f32 %v329_v39, %v327_v36 }
 0x136   :  { %v331_v41 = vrot.slane %v330_v40, 4 }
 0x138   :  { %v332_v42 = vadd.f32 %v331_v41, %v330_v40 }
 0x13a   :  { %v333_v43 = vrot.slane %v332_v42, 2 }
 0x13c   :  { %v334_v44 = vadd.f32 %v333_v43, %v332_v42 }
 0x13e   :  { %v335_v45 = vrot.slane %v334_v44, 1 }
 0x140   :  { %v336_v46 = vadd.f32 %v335_v45, %v334_v44 }
 0x142   :  { %v390_v47 = vmul.f32 -1.442695, %v336_v46 }
 0x144   :  { %518 = vpow2.f32 %v390_v47 }
 0x14e   :  { %v519_v48 = vpop.eup %518 }
 0x14f   :  { %v340_v49 = vadd.f32 1.0, %v519_v48 }
 0x151   :  { %520 = vrcp.f32 %v340_v49 }
 0x15b   :  { %v521_v50 = vpop.eup %520 }
 0x15c   :  { %343 = vst [vmem:[#allocation8] sm:$0x1] %v521_v50 }
 0x15d   :  { %599 = shalt.err (!%p596_p0)
}
 0x15e   :  { %s600_s6 = scalar_lea.hbm %s733_s4, 16 }
 0x15f   :  { %p601_p1 = scmp.ne.s32.totalorder %s733_s4, %s600_s6  ;;  %p604_p2 = scmp.lt.u32.totalorder %s600_s6, %s733_s4 }
 0x161   :  { %p606_p3 = pnand %p604_p2, %p601_p1 }
 0x163   :  { %609 = shalt.err (!%p606_p3)
}
 0x164   :  { %353 = dma.vmem_to_hbm [thread:$0]  %s351_s3, 16, %s733_s4, [#allocation4]  }
 0x165   :  { %614 = dma.done.wait [#allocation4], 16  }
 0x166   :  { %615 = vsyncadd [#allocation4], 4294967280 }
 0x167   :  { %357 = vsyncpa [#allocation3], 1 }
 0x168   :  { %358 = vsyncpa [#allocation6], 1 }
 0x169   :  { %359 = vsyncpa [#allocation4], 1 }

</bundles_post_ra>
